<compile_context>
chip_gen: v5e
topology: v5e:2x2
jax: 0.10.0
libtpu: 0.0.40
codegen_flags: <defaults>
</compile_context>

<pallas_src>
import functools
import numpy as np

import jax
import jax.numpy as jnp
from jax import lax
from jax.experimental import pallas as pl
from jax.experimental.pallas import tpu as pltpu


# ----------------------------------------------------------------------------
# Fused kernel: 3x3 conv (stride 1, pad 1, BN scale folded) + BN bias
#               + LeakyReLU(0.1) + 1x1 conv head + channel-packed YOLO decode.
# Layout inside the kernel: channels on sublanes, flattened H*W on lanes.
# ----------------------------------------------------------------------------
def _yolo_fused_kernel(x_ref, w1_ref, c1_ref, w2_ref, b2_ref,
                       dscale_ref, iswh_ref, isx_ref, isy_ref, rv_ref,
                       o_ref, *, H, W):
    HW = H * W
    x = x_ref[0]                                    # (Cin, HW + 2W + 2), bf16

    # Precomputed per-position row vectors (f32):
    #   row 0: mask_left  (0 where w == 0)
    #   row 1: mask_right (0 where w == W-1)
    #   row 2: gx (w index, f32)     row 3: gy (h index, f32)
    rv = rv_ref[...]                                # (4, HW)
    mask_l = rv[0:1, :]
    mask_r = rv[1:2, :]
    gx = rv[2:3, :]
    gy = rv[3:4, :]

    # --- 3x3 conv as 9 (Cmid,Cin)@(Cin,HW) MXU matmuls with f32 accumulation.
    # Flat zero-padding (W+1 each side) turns every tap into a static
    # lane-offset slice; only the W-edge wrap needs masking, once per dx group
    # (a single broadcast multiply by a precomputed 0/1 row vector).
    acc = None
    for dx in range(3):
        part = None
        for dy in range(3):
            off = dy * W + dx                       # static lane offset
            patch = x[:, off:off + HW]              # (Cin, HW) bf16
            d = jnp.dot(w1_ref[dy * 3 + dx], patch,
                        preferred_element_type=jnp.float32)
            part = d if part is None else part + d
        if dx == 0:      # ox = -1: w == 0 would read the previous row
            part = part * mask_l
        elif dx == 2:    # ox = +1: w == W-1 would read the next row
            part = part * mask_r
        acc = part if acc is None else acc + part

    # --- BN bias (scale folded into weights) + LeakyReLU(0.1), f32 elementwise.
    h = acc + c1_ref[...]                           # (Cmid,1) broadcast over lanes
    h = jnp.where(h > 0, h, 0.1 * h)

    # --- 1x1 conv head: (Cout2,Cmid)@(Cmid,HW) + bias, bf16 MXU operands.
    logits = jnp.dot(w2_ref[...], h.astype(jnp.bfloat16),
                     preferred_element_type=jnp.float32) + b2_ref[...]

    # --- channel-packed YOLO decode over the whole (Cout2, HW) tile:
    #     dec = (select(is_wh, exp, sigmoid) + isx*gx + isy*gy) * dscale
    sig = jax.nn.sigmoid(logits)
    ex = jnp.exp(logits)
    base = jnp.where(iswh_ref[...] > 0.5, ex, sig)
    grid_off = isx_ref[...] * gx + isy_ref[...] * gy   # (Cout2,1)*(1,HW)
    o_ref[0] = (base + grid_off) * dscale_ref[...]     # lane-dense f32 store


# ----------------------------------------------------------------------------
# Wrapper
# ----------------------------------------------------------------------------
def yolo_layer_forward(x_nchw, params, anchors, num_classes, img_dim):
    w1, gamma, beta, rmean, rvar, w2, b2 = params
    B, Cin, H, W = x_nchw.shape
    Cmid = w1.shape[-1]
    A = len(anchors)
    NC5 = num_classes + 5
    Cout2 = A * NC5
    assert H == W
    HW = H * W
    HWp = HW + 2 * (W + 1)
    stride = float(img_dim) / float(H)

    # ---- input: flatten spatial, zero-pad the flat axis by W+1 on each side
    #      (handles the h-edge taps), cast bf16.
    x_flat = x_nchw.reshape(B, Cin, HW).astype(jnp.bfloat16)
    x_ext = jnp.pad(x_flat, ((0, 0), (0, 0), (W + 1, W + 1)))

    # ---- folded BatchNorm: scale into conv weights, bias as (Cmid,1) column.
    scale_v = (gamma.astype(jnp.float32) /
               jnp.sqrt(rvar.astype(jnp.float32) + 1e-5))
    bias_v = beta.astype(jnp.float32) - rmean.astype(jnp.float32) * scale_v
    c1 = bias_v.reshape(Cmid, 1)

    # ---- 3x3 conv weights (HWIO) * BN scale -> per-tap (Cmid, Cin), bf16.
    w1_scaled = w1.astype(jnp.float32) * scale_v[None, None, None, :]
    w1_taps = jnp.transpose(w1_scaled, (0, 1, 3, 2)).reshape(
        9, Cmid, Cin).astype(jnp.bfloat16)

    # ---- 1x1 head weights: (Cout2, Cmid) bf16, bias as f32 column.
    w2t = jnp.transpose(w2, (1, 0)).astype(jnp.bfloat16)
    b2c = b2.astype(jnp.float32).reshape(Cout2, 1)

    # ---- channel-packed decode constants (compile-time, numpy).
    #      channel c = a*NC5 + j, j in [x, y, w, h, obj, cls...].
    j = np.arange(Cout2) % NC5
    a_of_c = np.arange(Cout2) // NC5
    aw = np.array([float(a[0]) for a in anchors], np.float32)
    ah = np.array([float(a[1]) for a in anchors], np.float32)

    dscale = np.ones((Cout2, 1), np.float32)
    dscale[j == 0, 0] = stride
    dscale[j == 1, 0] = stride
    dscale[j == 2, 0] = aw[a_of_c[j == 2]]   # exp(w) * (a_w/stride) * stride
    dscale[j == 3, 0] = ah[a_of_c[j == 3]]
    iswh = ((j == 2) | (j == 3)).astype(np.float32).reshape(Cout2, 1)
    isx = (j == 0).astype(np.float32).reshape(Cout2, 1)
    isy = (j == 1).astype(np.float32).reshape(Cout2, 1)

    # ---- per-position row vectors: edge masks + grid indices.
    colw = np.tile(np.arange(W, dtype=np.float32), H)
    rowh = np.repeat(np.arange(H, dtype=np.float32), W)
    rowvecs = np.stack([
        (colw != 0).astype(np.float32),
        (colw != W - 1).astype(np.float32),
        colw,
        rowh,
    ], 0)                                            # (4, HW)

    out_chw = pl.pallas_call(
        functools.partial(_yolo_fused_kernel, H=H, W=W),
        out_shape=jax.ShapeDtypeStruct((B, Cout2, HW), jnp.float32),
        grid=(B,),
        in_specs=[
            pl.BlockSpec((1, Cin, HWp), lambda b: (b, 0, 0)),
            pl.BlockSpec((9, Cmid, Cin), lambda b: (0, 0, 0)),
            pl.BlockSpec((Cmid, 1), lambda b: (0, 0)),
            pl.BlockSpec((Cout2, Cmid), lambda b: (0, 0)),
            pl.BlockSpec((Cout2, 1), lambda b: (0, 0)),
            pl.BlockSpec((Cout2, 1), lambda b: (0, 0)),
            pl.BlockSpec((Cout2, 1), lambda b: (0, 0)),
            pl.BlockSpec((Cout2, 1), lambda b: (0, 0)),
            pl.BlockSpec((Cout2, 1), lambda b: (0, 0)),
            pl.BlockSpec((4, HW), lambda b: (0, 0)),
        ],
        out_specs=pl.BlockSpec((1, Cout2, HW), lambda b: (b, 0, 0)),
        compiler_params=pltpu.CompilerParams(dimension_semantics=("parallel",)),
    )(x_ext, w1_taps, c1, w2t, b2c,
      jnp.asarray(dscale), jnp.asarray(iswh), jnp.asarray(isx), jnp.asarray(isy),
      jnp.asarray(rowvecs))

    # Anchor-major (B, A*G*G, 5+nc) reordering in XLA (small tensor, last dim is
    # only 5+nc so keeping it lane-dense inside the kernel and transposing here
    # is the right split).
    out = out_chw.reshape(B, A, NC5, H, W)
    out = jnp.transpose(out, (0, 1, 3, 4, 2)).reshape(B, A * HW, NC5)
    return out


# ----------------------------------------------------------------------------
# Pure-JAX f32 reference (mirrors the PyTorch forward) for verification
# ----------------------------------------------------------------------------
def reference_forward(x_nchw, params, anchors, num_classes, img_dim):
    w1, gamma, beta, rmean, rvar, w2, b2 = params
    A = len(anchors)
    NC5 = num_classes + 5
    x = jnp.transpose(x_nchw, (0, 2, 3, 1)).astype(jnp.float32)
    y = lax.conv_general_dilated(x, w1.astype(jnp.float32), (1, 1), "SAME",
                                 dimension_numbers=("NHWC", "HWIO", "NHWC"))
    scale = gamma / jnp.sqrt(rvar + 1e-5)
    y = y * scale + (beta - rmean * scale)
    y = jnp.where(y > 0, y, 0.1 * y)
    logits = jnp.einsum("bhwc,co->bhwo", y, w2) + b2
    B, H, W, _ = logits.shape
    stride = float(img_dim) / float(H)
    pred = logits.reshape(B, H, W, A, NC5).transpose(0, 3, 1, 2, 4)      # (B,A,H,W,NC5)
    gx = jnp.arange(W, dtype=jnp.float32)[None, None, None, :]
    gy = jnp.arange(H, dtype=jnp.float32)[None, None, :, None]
    aw = jnp.array([a[0] / stride for a in anchors], jnp.float32).reshape(1, A, 1, 1)
    ah = jnp.array([a[1] / stride for a in anchors], jnp.float32).reshape(1, A, 1, 1)
    bx = (jax.nn.sigmoid(pred[..., 0]) + gx) * stride
    by = (jax.nn.sigmoid(pred[..., 1]) + gy) * stride
    bw = jnp.exp(pred[..., 2]) * aw * stride
    bh = jnp.exp(pred[..., 3]) * ah * stride
    obj = jax.nn.sigmoid(pred[..., 4])
    cls = jax.nn.sigmoid(pred[..., 5:])
    boxes = jnp.stack([bx, by, bw, bh], -1).reshape(B, -1, 4)
    return jnp.concatenate([boxes, obj.reshape(B, -1, 1),
                            cls.reshape(B, -1, num_classes)], -1)


if __name__ == "__main__":
    # Small, module-consistent shapes.
    B, Cin, H, W = 2, 4, 16, 16
    num_classes = 2
    anchors = [(10.0, 13.0), (16.0, 30.0), (33.0, 23.0)]
    img_dim = 64
    Cmid = 2 * Cin
    Cout2 = (num_classes + 5) * len(anchors)

    key = jax.random.PRNGKey(0)
    k = jax.random.split(key, 8)
    x = jax.random.normal(k[0], (B, Cin, H, W), jnp.float32)             # NCHW input
    w1 = 0.1 * jax.random.normal(k[1], (3, 3, Cin, Cmid), jnp.float32)   # HWIO
    gamma = 1.0 + 0.1 * jax.random.normal(k[2], (Cmid,), jnp.float32)
    beta = 0.1 * jax.random.normal(k[3], (Cmid,), jnp.float32)
    rmean = 0.1 * jax.random.normal(k[4], (Cmid,), jnp.float32)
    rvar = 1.0 + jax.random.uniform(k[5], (Cmid,), jnp.float32)
    w2 = 0.1 * jax.random.normal(k[6], (Cmid, Cout2), jnp.float32)       # 1x1 conv weight
    b2 = 0.1 * jax.random.normal(k[7], (Cout2,), jnp.float32)
    params = (w1, gamma, beta, rmean, rvar, w2, b2)

    out = jax.block_until_ready(
        yolo_layer_forward(x, params, anchors, num_classes, img_dim))
    ref = jax.block_until_ready(
        reference_forward(x, params, anchors, num_classes, img_dim))

    assert out.shape == (B, len(anchors) * H * W, num_classes + 5), out.shape
    # bf16 MXU operands (f32 accumulation) -> loosened tolerance vs f32 reference.
    np.testing.assert_allclose(np.asarray(out), np.asarray(ref), rtol=2e-2, atol=2e-2)

    print("KERNEL_OK")
</pallas_src>

<mosaic_0001>
module attributes {stable_mosaic.version = 11 : i64} {
  func.func @_yolo_fused_kernel(%arg0: i32, %arg1: memref<1x4x290xbf16, #tpu.memory_space<vmem>>, %arg2: memref<9x8x4xbf16, #tpu.memory_space<vmem>>, %arg3: memref<8x1xf32, #tpu.memory_space<vmem>>, %arg4: memref<21x8xbf16, #tpu.memory_space<vmem>>, %arg5: memref<21x1xf32, #tpu.memory_space<vmem>>, %arg6: memref<21x1xf32, #tpu.memory_space<vmem>>, %arg7: memref<21x1xf32, #tpu.memory_space<vmem>>, %arg8: memref<21x1xf32, #tpu.memory_space<vmem>>, %arg9: memref<21x1xf32, #tpu.memory_space<vmem>>, %arg10: memref<4x256xf32, #tpu.memory_space<vmem>>, %arg11: memref<1x21x256xf32, #tpu.memory_space<vmem>>) attributes {dimension_semantics = [#tpu.dimension_semantics<parallel>], iteration_bounds = array<i64: 2>, scalar_prefetch = 0 : i64, scratch_operands = 0 : i64, tpu.core_type = #tpu.core_type<tc>, window_params = [{transform_indices = @transform_0, window_bounds = array<i64: 1, 4, 290>}, {pipeline_mode = #tpu.pipeline_mode<synchronous>, transform_indices = @transform_1, window_bounds = array<i64: 9, 8, 4>}, {pipeline_mode = #tpu.pipeline_mode<synchronous>, transform_indices = @transform_2, window_bounds = array<i64: 8, 1>}, {pipeline_mode = #tpu.pipeline_mode<synchronous>, transform_indices = @transform_3, window_bounds = array<i64: 21, 8>}, {pipeline_mode = #tpu.pipeline_mode<synchronous>, transform_indices = @transform_4, window_bounds = array<i64: 21, 1>}, {pipeline_mode = #tpu.pipeline_mode<synchronous>, transform_indices = @transform_5, window_bounds = array<i64: 21, 1>}, {pipeline_mode = #tpu.pipeline_mode<synchronous>, transform_indices = @transform_6, window_bounds = array<i64: 21, 1>}, {pipeline_mode = #tpu.pipeline_mode<synchronous>, transform_indices = @transform_7, window_bounds = array<i64: 21, 1>}, {pipeline_mode = #tpu.pipeline_mode<synchronous>, transform_indices = @transform_8, window_bounds = array<i64: 21, 1>}, {pipeline_mode = #tpu.pipeline_mode<synchronous>, transform_indices = @transform_9, window_bounds = array<i64: 4, 256>}, {transform_indices = @transform_10, window_bounds = array<i64: 1, 21, 256>}]} {
    %c0 = arith.constant 0 : index
    %c0_0 = arith.constant 0 : index
    %c0_1 = arith.constant 0 : index
    %0 = vector.load %arg1[%c0, %c0_0, %c0_1] : memref<1x4x290xbf16, #tpu.memory_space<vmem>>, vector<1x4x290xbf16>
    %1 = vector.shape_cast %0 : vector<1x4x290xbf16> to vector<4x290xbf16>
    %c0_2 = arith.constant 0 : index
    %c0_3 = arith.constant 0 : index
    %2 = vector.load %arg10[%c0_2, %c0_3] : memref<4x256xf32, #tpu.memory_space<vmem>>, vector<4x256xf32>
    %3 = vector.extract_strided_slice %2 {offsets = [0, 0], sizes = [1, 256], strides = [1, 1]} : vector<4x256xf32> to vector<1x256xf32>
    %4 = vector.extract_strided_slice %2 {offsets = [1, 0], sizes = [1, 256], strides = [1, 1]} : vector<4x256xf32> to vector<1x256xf32>
    %5 = vector.extract_strided_slice %2 {offsets = [2, 0], sizes = [1, 256], strides = [1, 1]} : vector<4x256xf32> to vector<1x256xf32>
    %6 = vector.extract_strided_slice %2 {offsets = [3, 0], sizes = [1, 256], strides = [1, 1]} : vector<4x256xf32> to vector<1x256xf32>
    %7 = vector.extract_strided_slice %1 {offsets = [0, 0], sizes = [4, 256], strides = [1, 1]} : vector<4x290xbf16> to vector<4x256xbf16>
    %c0_4 = arith.constant 0 : index
    %c0_5 = arith.constant 0 : index
    %c0_6 = arith.constant 0 : index
    %8 = vector.load %arg2[%c0_4, %c0_5, %c0_6] : memref<9x8x4xbf16, #tpu.memory_space<vmem>>, vector<1x8x4xbf16>
    %9 = vector.shape_cast %8 : vector<1x8x4xbf16> to vector<8x4xbf16>
    %cst = arith.constant dense<0.000000e+00> : vector<8x256xf32>
    %10 = tpu.matmul %9, %7, %cst {dimension_numbers = #tpu.dot_dimension_numbers<[1], [0], [0], [1], [0, 0, 1, 1], [], []>} : vector<8x4xbf16>, vector<4x256xbf16>, vector<8x256xf32> -> vector<8x256xf32>
    %11 = vector.extract_strided_slice %1 {offsets = [0, 16], sizes = [4, 256], strides = [1, 1]} : vector<4x290xbf16> to vector<4x256xbf16>
    %c3 = arith.constant 3 : index
    %c0_7 = arith.constant 0 : index
    %c0_8 = arith.constant 0 : index
    %12 = vector.load %arg2[%c3, %c0_7, %c0_8] : memref<9x8x4xbf16, #tpu.memory_space<vmem>>, vector<1x8x4xbf16>
    %13 = vector.shape_cast %12 : vector<1x8x4xbf16> to vector<8x4xbf16>
    %cst_9 = arith.constant dense<0.000000e+00> : vector<8x256xf32>
    %14 = tpu.matmul %13, %11, %cst_9 {dimension_numbers = #tpu.dot_dimension_numbers<[1], [0], [0], [1], [0, 0, 1, 1], [], []>} : vector<8x4xbf16>, vector<4x256xbf16>, vector<8x256xf32> -> vector<8x256xf32>
    %15 = arith.addf %10, %14 : vector<8x256xf32>
    %16 = vector.extract_strided_slice %1 {offsets = [0, 32], sizes = [4, 256], strides = [1, 1]} : vector<4x290xbf16> to vector<4x256xbf16>
    %c6 = arith.constant 6 : index
    %c0_10 = arith.constant 0 : index
    %c0_11 = arith.constant 0 : index
    %17 = vector.load %arg2[%c6, %c0_10, %c0_11] : memref<9x8x4xbf16, #tpu.memory_space<vmem>>, vector<1x8x4xbf16>
    %18 = vector.shape_cast %17 : vector<1x8x4xbf16> to vector<8x4xbf16>
    %cst_12 = arith.constant dense<0.000000e+00> : vector<8x256xf32>
    %19 = tpu.matmul %18, %16, %cst_12 {dimension_numbers = #tpu.dot_dimension_numbers<[1], [0], [0], [1], [0, 0, 1, 1], [], []>} : vector<8x4xbf16>, vector<4x256xbf16>, vector<8x256xf32> -> vector<8x256xf32>
    %20 = arith.addf %15, %19 : vector<8x256xf32>
    %21 = vector.broadcast %3 : vector<1x256xf32> to vector<8x256xf32>
    %22 = arith.mulf %20, %21 : vector<8x256xf32>
    %23 = vector.extract_strided_slice %1 {offsets = [0, 1], sizes = [4, 256], strides = [1, 1]} : vector<4x290xbf16> to vector<4x256xbf16>
    %c1 = arith.constant 1 : index
    %c0_13 = arith.constant 0 : index
    %c0_14 = arith.constant 0 : index
    %24 = vector.load %arg2[%c1, %c0_13, %c0_14] : memref<9x8x4xbf16, #tpu.memory_space<vmem>>, vector<1x8x4xbf16>
    %25 = vector.shape_cast %24 : vector<1x8x4xbf16> to vector<8x4xbf16>
    %cst_15 = arith.constant dense<0.000000e+00> : vector<8x256xf32>
    %26 = tpu.matmul %25, %23, %cst_15 {dimension_numbers = #tpu.dot_dimension_numbers<[1], [0], [0], [1], [0, 0, 1, 1], [], []>} : vector<8x4xbf16>, vector<4x256xbf16>, vector<8x256xf32> -> vector<8x256xf32>
    %27 = vector.extract_strided_slice %1 {offsets = [0, 17], sizes = [4, 256], strides = [1, 1]} : vector<4x290xbf16> to vector<4x256xbf16>
    %c4 = arith.constant 4 : index
    %c0_16 = arith.constant 0 : index
    %c0_17 = arith.constant 0 : index
    %28 = vector.load %arg2[%c4, %c0_16, %c0_17] : memref<9x8x4xbf16, #tpu.memory_space<vmem>>, vector<1x8x4xbf16>
    %29 = vector.shape_cast %28 : vector<1x8x4xbf16> to vector<8x4xbf16>
    %cst_18 = arith.constant dense<0.000000e+00> : vector<8x256xf32>
    %30 = tpu.matmul %29, %27, %cst_18 {dimension_numbers = #tpu.dot_dimension_numbers<[1], [0], [0], [1], [0, 0, 1, 1], [], []>} : vector<8x4xbf16>, vector<4x256xbf16>, vector<8x256xf32> -> vector<8x256xf32>
    %31 = arith.addf %26, %30 : vector<8x256xf32>
    %32 = vector.extract_strided_slice %1 {offsets = [0, 33], sizes = [4, 256], strides = [1, 1]} : vector<4x290xbf16> to vector<4x256xbf16>
    %c7 = arith.constant 7 : index
    %c0_19 = arith.constant 0 : index
    %c0_20 = arith.constant 0 : index
    %33 = vector.load %arg2[%c7, %c0_19, %c0_20] : memref<9x8x4xbf16, #tpu.memory_space<vmem>>, vector<1x8x4xbf16>
    %34 = vector.shape_cast %33 : vector<1x8x4xbf16> to vector<8x4xbf16>
    %cst_21 = arith.constant dense<0.000000e+00> : vector<8x256xf32>
    %35 = tpu.matmul %34, %32, %cst_21 {dimension_numbers = #tpu.dot_dimension_numbers<[1], [0], [0], [1], [0, 0, 1, 1], [], []>} : vector<8x4xbf16>, vector<4x256xbf16>, vector<8x256xf32> -> vector<8x256xf32>
    %36 = arith.addf %31, %35 : vector<8x256xf32>
    %37 = arith.addf %22, %36 : vector<8x256xf32>
    %38 = vector.extract_strided_slice %1 {offsets = [0, 2], sizes = [4, 256], strides = [1, 1]} : vector<4x290xbf16> to vector<4x256xbf16>
    %c2 = arith.constant 2 : index
    %c0_22 = arith.constant 0 : index
    %c0_23 = arith.constant 0 : index
    %39 = vector.load %arg2[%c2, %c0_22, %c0_23] : memref<9x8x4xbf16, #tpu.memory_space<vmem>>, vector<1x8x4xbf16>
    %40 = vector.shape_cast %39 : vector<1x8x4xbf16> to vector<8x4xbf16>
    %cst_24 = arith.constant dense<0.000000e+00> : vector<8x256xf32>
    %41 = tpu.matmul %40, %38, %cst_24 {dimension_numbers = #tpu.dot_dimension_numbers<[1], [0], [0], [1], [0, 0, 1, 1], [], []>} : vector<8x4xbf16>, vector<4x256xbf16>, vector<8x256xf32> -> vector<8x256xf32>
    %42 = vector.extract_strided_slice %1 {offsets = [0, 18], sizes = [4, 256], strides = [1, 1]} : vector<4x290xbf16> to vector<4x256xbf16>
    %c5 = arith.constant 5 : index
    %c0_25 = arith.constant 0 : index
    %c0_26 = arith.constant 0 : index
    %43 = vector.load %arg2[%c5, %c0_25, %c0_26] : memref<9x8x4xbf16, #tpu.memory_space<vmem>>, vector<1x8x4xbf16>
    %44 = vector.shape_cast %43 : vector<1x8x4xbf16> to vector<8x4xbf16>
    %cst_27 = arith.constant dense<0.000000e+00> : vector<8x256xf32>
    %45 = tpu.matmul %44, %42, %cst_27 {dimension_numbers = #tpu.dot_dimension_numbers<[1], [0], [0], [1], [0, 0, 1, 1], [], []>} : vector<8x4xbf16>, vector<4x256xbf16>, vector<8x256xf32> -> vector<8x256xf32>
    %46 = arith.addf %41, %45 : vector<8x256xf32>
    %47 = vector.extract_strided_slice %1 {offsets = [0, 34], sizes = [4, 256], strides = [1, 1]} : vector<4x290xbf16> to vector<4x256xbf16>
    %c8 = arith.constant 8 : index
    %c0_28 = arith.constant 0 : index
    %c0_29 = arith.constant 0 : index
    %48 = vector.load %arg2[%c8, %c0_28, %c0_29] : memref<9x8x4xbf16, #tpu.memory_space<vmem>>, vector<1x8x4xbf16>
    %49 = vector.shape_cast %48 : vector<1x8x4xbf16> to vector<8x4xbf16>
    %cst_30 = arith.constant dense<0.000000e+00> : vector<8x256xf32>
    %50 = tpu.matmul %49, %47, %cst_30 {dimension_numbers = #tpu.dot_dimension_numbers<[1], [0], [0], [1], [0, 0, 1, 1], [], []>} : vector<8x4xbf16>, vector<4x256xbf16>, vector<8x256xf32> -> vector<8x256xf32>
    %51 = arith.addf %46, %50 : vector<8x256xf32>
    %52 = vector.broadcast %4 : vector<1x256xf32> to vector<8x256xf32>
    %53 = arith.mulf %51, %52 : vector<8x256xf32>
    %54 = arith.addf %37, %53 : vector<8x256xf32>
    %c0_31 = arith.constant 0 : index
    %c0_32 = arith.constant 0 : index
    %55 = vector.load %arg3[%c0_31, %c0_32] : memref<8x1xf32, #tpu.memory_space<vmem>>, vector<8x1xf32>
    %56 = vector.broadcast %55 : vector<8x1xf32> to vector<8x256xf32>
    %57 = arith.addf %54, %56 : vector<8x256xf32>
    %cst_33 = arith.constant 0.000000e+00 : f32
    %58 = vector.broadcast %cst_33 : f32 to vector<8x256xf32>
    %59 = arith.cmpf ogt, %57, %58 : vector<8x256xf32>
    %cst_34 = arith.constant 1.000000e-01 : f32
    %60 = vector.broadcast %cst_34 : f32 to vector<8x256xf32>
    %61 = arith.mulf %60, %57 : vector<8x256xf32>
    %62 = arith.select %59, %57, %61 : vector<8x256xi1>, vector<8x256xf32>
    %c0_35 = arith.constant 0 : index
    %c0_36 = arith.constant 0 : index
    %63 = vector.load %arg4[%c0_35, %c0_36] : memref<21x8xbf16, #tpu.memory_space<vmem>>, vector<21x8xbf16>
    %64 = arith.truncf %62 : vector<8x256xf32> to vector<8x256xbf16>
    %cst_37 = arith.constant dense<0.000000e+00> : vector<21x256xf32>
    %65 = tpu.matmul %63, %64, %cst_37 {dimension_numbers = #tpu.dot_dimension_numbers<[1], [0], [0], [1], [0, 0, 1, 1], [], []>} : vector<21x8xbf16>, vector<8x256xbf16>, vector<21x256xf32> -> vector<21x256xf32>
    %c0_38 = arith.constant 0 : index
    %c0_39 = arith.constant 0 : index
    %66 = vector.load %arg5[%c0_38, %c0_39] : memref<21x1xf32, #tpu.memory_space<vmem>>, vector<21x1xf32>
    %67 = vector.broadcast %66 : vector<21x1xf32> to vector<21x256xf32>
    %68 = arith.addf %65, %67 : vector<21x256xf32>
    %69 = arith.negf %68 : vector<21x256xf32>
    %70 = math.exp %69 : vector<21x256xf32>
    %cst_40 = arith.constant 1.000000e+00 : f32
    %71 = vector.broadcast %cst_40 : f32 to vector<21x256xf32>
    %72 = arith.addf %71, %70 : vector<21x256xf32>
    %73 = arith.divf %71, %72 : vector<21x256xf32>
    %74 = math.exp %68 : vector<21x256xf32>
    %c0_41 = arith.constant 0 : index
    %c0_42 = arith.constant 0 : index
    %75 = vector.load %arg7[%c0_41, %c0_42] : memref<21x1xf32, #tpu.memory_space<vmem>>, vector<21x1xf32>
    %cst_43 = arith.constant 5.000000e-01 : f32
    %76 = vector.broadcast %cst_43 : f32 to vector<21x1xf32>
    %77 = arith.cmpf ogt, %75, %76 : vector<21x1xf32>
    %78 = vector.shape_cast %77 : vector<21x1xi1> to vector<21x1xi1>
    %79 = vector.broadcast %78 : vector<21x1xi1> to vector<21x256xi1>
    %80 = arith.select %79, %74, %73 : vector<21x256xi1>, vector<21x256xf32>
    %c0_44 = arith.constant 0 : index
    %c0_45 = arith.constant 0 : index
    %81 = vector.load %arg8[%c0_44, %c0_45] : memref<21x1xf32, #tpu.memory_space<vmem>>, vector<21x1xf32>
    %82 = vector.broadcast %81 : vector<21x1xf32> to vector<21x256xf32>
    %83 = vector.broadcast %5 : vector<1x256xf32> to vector<21x256xf32>
    %84 = arith.mulf %82, %83 : vector<21x256xf32>
    %c0_46 = arith.constant 0 : index
    %c0_47 = arith.constant 0 : index
    %85 = vector.load %arg9[%c0_46, %c0_47] : memref<21x1xf32, #tpu.memory_space<vmem>>, vector<21x1xf32>
    %86 = vector.broadcast %85 : vector<21x1xf32> to vector<21x256xf32>
    %87 = vector.broadcast %6 : vector<1x256xf32> to vector<21x256xf32>
    %88 = arith.mulf %86, %87 : vector<21x256xf32>
    %89 = arith.addf %84, %88 : vector<21x256xf32>
    %90 = arith.addf %80, %89 : vector<21x256xf32>
    %c0_48 = arith.constant 0 : index
    %c0_49 = arith.constant 0 : index
    %91 = vector.load %arg6[%c0_48, %c0_49] : memref<21x1xf32, #tpu.memory_space<vmem>>, vector<21x1xf32>
    %92 = vector.broadcast %91 : vector<21x1xf32> to vector<21x256xf32>
    %93 = arith.mulf %90, %92 : vector<21x256xf32>
    %c0_50 = arith.constant 0 : index
    %c0_51 = arith.constant 0 : index
    %c0_52 = arith.constant 0 : index
    %94 = vector.load %arg11[%c0_50, %c0_51, %c0_52] : memref<1x21x256xf32, #tpu.memory_space<vmem>>, vector<1x21x256xf32>
    %95 = vector.shape_cast %94 : vector<1x21x256xf32> to vector<21x256xf32>
    %96 = vector.shape_cast %93 : vector<21x256xf32> to vector<1x21x256xf32>
    tpu.vector_store %arg11[%c0_50, %c0_51, %c0_52], %96 {strides = array<i32>} : memref<1x21x256xf32, #tpu.memory_space<vmem>>, vector<1x21x256xf32>,
    return
  }
  func.func @transform_0(%arg0: i32) -> (i32, i32, i32) {
    %c0_i32 = arith.constant 0 : i32
    %c0_i32_0 = arith.constant 0 : i32
    %c0_i32_1 = arith.constant 0 : i32
    return %arg0, %c0_i32, %c0_i32_0 : i32, i32, i32
  }
  func.func @transform_1(%arg0: i32) -> (i32, i32, i32) {
    %c0_i32 = arith.constant 0 : i32
    %c0_i32_0 = arith.constant 0 : i32
    %c0_i32_1 = arith.constant 0 : i32
    %c0_i32_2 = arith.constant 0 : i32
    return %c0_i32, %c0_i32_0, %c0_i32_1 : i32, i32, i32
  }
  func.func @transform_2(%arg0: i32) -> (i32, i32) {
    %c0_i32 = arith.constant 0 : i32
    %c0_i32_0 = arith.constant 0 : i32
    %c0_i32_1 = arith.constant 0 : i32
    return %c0_i32, %c0_i32_0 : i32, i32
  }
  func.func @transform_3(%arg0: i32) -> (i32, i32) {
    %c0_i32 = arith.constant 0 : i32
    %c0_i32_0 = arith.constant 0 : i32
    %c0_i32_1 = arith.constant 0 : i32
    return %c0_i32, %c0_i32_0 : i32, i32
  }
  func.func @transform_4(%arg0: i32) -> (i32, i32) {
    %c0_i32 = arith.constant 0 : i32
    %c0_i32_0 = arith.constant 0 : i32
    %c0_i32_1 = arith.constant 0 : i32
    return %c0_i32, %c0_i32_0 : i32, i32
  }
  func.func @transform_5(%arg0: i32) -> (i32, i32) {
    %c0_i32 = arith.constant 0 : i32
    %c0_i32_0 = arith.constant 0 : i32
    %c0_i32_1 = arith.constant 0 : i32
    return %c0_i32, %c0_i32_0 : i32, i32
  }
  func.func @transform_6(%arg0: i32) -> (i32, i32) {
    %c0_i32 = arith.constant 0 : i32
    %c0_i32_0 = arith.constant 0 : i32
    %c0_i32_1 = arith.constant 0 : i32
    return %c0_i32, %c0_i32_0 : i32, i32
  }
  func.func @transform_7(%arg0: i32) -> (i32, i32) {
    %c0_i32 = arith.constant 0 : i32
    %c0_i32_0 = arith.constant 0 : i32
    %c0_i32_1 = arith.constant 0 : i32
    return %c0_i32, %c0_i32_0 : i32, i32
  }
  func.func @transform_8(%arg0: i32) -> (i32, i32) {
    %c0_i32 = arith.constant 0 : i32
    %c0_i32_0 = arith.constant 0 : i32
    %c0_i32_1 = arith.constant 0 : i32
    return %c0_i32, %c0_i32_0 : i32, i32
  }
  func.func @transform_9(%arg0: i32) -> (i32, i32) {
    %c0_i32 = arith.constant 0 : i32
    %c0_i32_0 = arith.constant 0 : i32
    %c0_i32_1 = arith.constant 0 : i32
    return %c0_i32, %c0_i32_0 : i32, i32
  }
  func.func @transform_10(%arg0: i32) -> (i32, i32, i32) {
    %c0_i32 = arith.constant 0 : i32
    %c0_i32_0 = arith.constant 0 : i32
    %c0_i32_1 = arith.constant 0 : i32
    return %arg0, %c0_i32, %c0_i32_0 : i32, i32, i32
  }
}

</mosaic_0001>

<bundles_post_ra>
// kernel: tpu_custom_call.1
= control target key start
LH: loop header
LB: loop body
LE: loop exit
PB: predicated region body
PF: predicated region fallthrough
CT: control target
= control target key end

     0   :  { %s1439_s13 = smov 0   ;;  %s1711_s0 = inlined_call_operand.vmem [shape: bf16[2,4,290], index: 0, kind: input, shape index: {}]   ;;  %s1712_s1 = inlined_call_operand.vmem [shape: bf16[9,8,4], index: 1, kind: input, shape index: {}]   ;;  %s1713_s2 = inlined_call_operand.vmem [shape: f32[8,1], index: 2, kind: input, shape index: {}]   ;;  %s1714_s3 = inlined_call_operand.vmem [shape: bf16[21,8], index: 3, kind: input, shape index: {}]   ;;  %s1715_s4 = inlined_call_operand.vmem [shape: f32[21,1], index: 4, kind: input, shape index: {}]   ;;  %s1716_s5 = inlined_call_operand.vmem [shape: f32[21,1], index: 5, kind: input, shape index: {}]   ;;  %s1717_s6 = inlined_call_operand.vmem [shape: f32[21,1], index: 6, kind: input, shape index: {}]   ;;  %s1718_s7 = inlined_call_operand.vmem [shape: f32[21,1], index: 7, kind: input, shape index: {}]   ;;  %s1719_s8 = inlined_call_operand.vmem [shape: f32[21,1], index: 8, kind: input, shape index: {}]   ;;  %s1720_s9 = inlined_call_operand.vmem [shape: f32[4,256], index: 9, kind: input, shape index: {}]   ;;  %s1721_s10 = inlined_call_operand.vmem [shape: f32[2,21,256], index: 10, kind: output, shape index: {}]  }
   0x1 LB: > { %s1259_s14 = sadd.s32 4294967295, %s1373_s13   ;;  %p1263_p0 = scmp.ge.s32.totalorder %s1373_s13, 1  ;;  %s1373_s13 = sphi %s1439_s13, %s20_s13  }
   0x2   : > { %p312_p1 = scmp.lt.s32.totalorder %s1373_s13, 3 }
   0x4   : > { %p313_p2 = pnand %p1263_p0, %p312_p1 }
   0x5   : > { %p350_p3 = scmp.lt.s32.totalorder (!%p313_p2), %s1259_s14, 1  ;;  %s1375_s19 = smov (!%p313_p2), 112  }
   0x6   : > { %316 = sbr.rel (%p313_p2) target bundleno = 546 (0x222), region = 60  ;;  %s1376_s20 = smov (!%p313_p2), 96  }
   0x7   : > { %s1377_s21 = smov (!%p313_p2), 111   ;;  %s1378_s22 = smov (!%p313_p2), 127  }
   0x8   : > { %s1379_s23 = smov (!%p313_p2), 95   ;;  %s1380_s24 = smov (!%p313_p2), 110  }
   0x9   : > { %s1381_s25 = smov (!%p313_p2), 126   ;;  %s1382_s26 = smov (!%p313_p2), 94  }
   0xb   : > { %s1725_s14 = smov (!%p350_p3, %s1259_s14), 1  ;;  %vm387_vm0 = vcmask 1041408   ;;  %v363_v29 = vld [vmem:[%s1712_s1] sm:$0xf]  ;;  %vm383_vm1 = vcmask 31744   ;;  %vm471_vm2 = vcmask 785408  }
   0xc   : > { %s1309_s15 = smul.u32 6, %s1725_s14  ;;  %vm380_vm3 = vcmask 916480   ;;  %v1266_v41 = vld [vmem:[%s1712_s1 + $0xc] sm:$0xf]  ;;  %vm537_vm4 = vcmask 908288   ;;  %vm588_vm5 = vcmask 1039360  }
   0xd   : > { %v1271_v49 = vld [vmem:[%s1712_s1 + $0x18] sm:$0xf]  ;;  %v1275_v53 = vld [vmem:[%s1712_s1 + $0x10] sm:$0xf]  ;;  %v1383_v56 = vmov 0   ;;  %v854_v61 = vld [vmem:[%s1713_s2] sm:$0xff] }
   0xe   : > { %s354_s18 = scalar_lea.vmem %s1711_s0, %s1309_s15  ;;  %1328 = vset.pattern.permute.xlu0 %v1383_v56  ;;  %1329 = vset.pattern.permute.xlu1 %v1383_v56  ;;  %v1076_v62 = vld [vmem:[%s1717_s6 + $0x8] sm:$0xff]  ;;  %vm641_vm7 = vcmask 777216   ;;  %vm700_vm8 = vcmask 900096   ;;  %vm751_vm9 = vcmask 1031168   ;;  %vm804_vm10 = vcmask 769024   ;;  %s1310_s29 = smul.u32 48, %s1725_s14 }
   0xf   : > { %v361_v0 = vld [vmem:[%s354_s18] sm:$0x3f]  ;;  %1330 = vset.pattern.permute.xlu2 %v1383_v56  ;;  %vm1079_vm6 = vcmp.gt.f32.partialorder %v1076_v62, 0.5  ;;  %vm906_vm15 = vcmask 1043456  }
  0x10   : > { %367 = vst [vmem:[#allocation1] ss:$4 sm:$0xff] %v361_v0  ;;  %s1667_s11 = scalar_lea.vmem %s1721_s10, %s1310_s29 }
  0x17   : > { %v368_v1 = vld.sshfl [vmem:[#allocation1] sm:$0xff pattern:$0x73625140]  ;;  %v372_v2 = vld.sshfl [vmem:[#allocation1 + $0x10] sm:$0xff pattern:$0x73625140] }
  0x18   : > { %374 = vrot.lane.b32.xlu0 %v368_v1, %s1375_s19  ;;  %378 = vrot.lane.b32.xlu1 %v372_v2, %s1375_s19  ;;  %v370_v3 = vld.sshfl [vmem:[#allocation1 + $0x8] sm:$0xff pattern:$0x73625140]  ;;  %v1274_v1 = vld [vmem:[%s1712_s1 + $0x4] sm:$0xf]  ;;  %v1082_v2 = vsel %vm1079_vm6, 1, %v1383_v56 }
  0x19   : > { %420 = vst [vmem:[#allocation1] ss:$4 sm:$0xff] %v361_v0 }
  0x20   : > { %376 = vrot.lane.b32.xlu0 %v370_v3, %s1375_s19  ;;  %v421_v4 = vld.sshfl [vmem:[#allocation1] sm:$0xff pattern:$0x73625140]  ;;  %v422_v5 = vld.sshfl [vmem:[#allocation1 + $0x8] sm:$0xff pattern:$0x73625140] }
  0x21   : > { %458 = vst [vmem:[#allocation1] ss:$4 sm:$0xff] %v361_v0  ;;  %v426_v27 = vsel %vm387_vm0, %v421_v4, 0  ;;  %v428_v28 = vsel %vm387_vm0, %v422_v5, 0 }
  0x22   : > { %437 = vmatpush.bf16.msra.mxu2 %v426_v27  ;;  %450 = vmatpush.bf16.msra.mxu3 %v428_v28  ;;  %v1283_v27 = vld [vmem:[%s1712_s1 + $0x8] sm:$0xf] }
  0x23   : > { %v1175_v28 = vld [vmem:[%s1716_s5 + $0x8] sm:$0xff] }
  0x25   : > { %1270 = vmatmul.msk.bf16.vlgmr.msra.gmra.mxu3 %vm383_vm1, %v363_v29  ;;  %1269 = vmatmul.msk.bf16.vlgmr.msra.gmra.mxu2 %vm383_vm1, %v363_v29 }
  0x28   : > { %v459_v6 = vld.sshfl [vmem:[#allocation1] sm:$0xff pattern:$0x73625140]  ;;  %v461_v7 = vld.sshfl [vmem:[#allocation1 + $0x8] sm:$0xff pattern:$0x73625140] }
  0x29   : > { %v463_v8 = vld.sshfl [vmem:[#allocation1 + $0x10] sm:$0xff pattern:$0x73625140]  ;;  %465 = vrot.lane.b32.xlu1 %v459_v6, %s1376_s20  ;;  %467 = vrot.lane.b32.xlu2 %v461_v7, %s1376_s20 }
  0x2a   : > { %524 = vst [vmem:[#allocation1] ss:$4 sm:$0xff] %v361_v0 }
  0x31   : > { %v529_v9 = vld.sshfl [vmem:[#allocation1 + $0x10] sm:$0xff pattern:$0x73625140]  ;;  %v527_v10 = vld.sshfl [vmem:[#allocation1 + $0x8] sm:$0xff pattern:$0x73625140]  ;;  %469 = vrot.lane.b32.xlu2 %v463_v8, %s1376_s20 }
  0x32   : > { %533 = vrot.lane.b32.xlu1 %v527_v10, %s1377_s21  ;;  %v525_v11 = vld.sshfl [vmem:[#allocation1] sm:$0xff pattern:$0x73625140] }
  0x33   : > { %531 = vrot.lane.b32.xlu0 %v525_v11, %s1377_s21  ;;  %575 = vst [vmem:[#allocation1] ss:$4 sm:$0xff] %v361_v0  ;;  %v1103_v11 = vld [vmem:[%s1718_s7 + $0x8] sm:$0xff] }
  0x39   : > { %535 = vrot.lane.b32.xlu2 %v529_v9, %s1377_s21  ;;  %v1280_v9 = vld [vmem:[%s1712_s1 + $0x1c] sm:$0xf] }
  0x3a   : > { %v578_v12 = vld.sshfl [vmem:[#allocation1 + $0x8] sm:$0xff pattern:$0x73625140]  ;;  %v580_v13 = vld.sshfl [vmem:[#allocation1 + $0x10] sm:$0xff pattern:$0x73625140] }
  0x3b   : > { %584 = vrot.lane.b32.xlu1 %v578_v12, %s1378_s22  ;;  %v576_v14 = vld.sshfl [vmem:[#allocation1] sm:$0xff pattern:$0x73625140] }
  0x3c   : > { %582 = vrot.lane.b32.xlu0 %v576_v14, %s1378_s22  ;;  %628 = vst [vmem:[#allocation1] ss:$4 sm:$0xff] %v361_v0 }
  0x41   : > { %586 = vrot.lane.b32.xlu2 %v580_v13, %s1378_s22 }
  0x43   : > { %v631_v15 = vld.sshfl [vmem:[#allocation1 + $0x8] sm:$0xff pattern:$0x73625140]  ;;  %v633_v16 = vld.sshfl [vmem:[#allocation1 + $0x10] sm:$0xff pattern:$0x73625140] }
  0x44   : > { %637 = vrot.lane.b32.xlu1 %v631_v15, %s1379_s23  ;;  %v629_v17 = vld.sshfl [vmem:[#allocation1] sm:$0xff pattern:$0x73625140] }
  0x45   : > { %635 = vrot.lane.b32.xlu0 %v629_v17, %s1379_s23  ;;  %687 = vst [vmem:[#allocation1] ss:$4 sm:$0xff] %v361_v0 }
  0x49   : > { %639 = vrot.lane.b32.xlu2 %v633_v16, %s1379_s23 }
  0x4c   : > { %v690_v18 = vld.sshfl [vmem:[#allocation1 + $0x8] sm:$0xff pattern:$0x73625140]  ;;  %v692_v19 = vld.sshfl [vmem:[#allocation1 + $0x10] sm:$0xff pattern:$0x73625140] }
  0x4d   : > { %696 = vrot.lane.b32.xlu1 %v690_v18, %s1380_s24  ;;  %v688_v20 = vld.sshfl [vmem:[#allocation1] sm:$0xff pattern:$0x73625140]  ;;  %v1284_v18 = vld [vmem:[%s1712_s1 + $0x14] sm:$0xf] }
  0x4e   : > { %694 = vrot.lane.b32.xlu0 %v688_v20, %s1380_s24  ;;  %738 = vst [vmem:[#allocation1] ss:$4 sm:$0xff] %v361_v0 }
  0x51   : > { %698 = vrot.lane.b32.xlu2 %v692_v19, %s1380_s24  ;;  %v1133_v19 = vld [vmem:[%s1719_s8 + $0x8] sm:$0xff] }
  0x55   : > { %v743_v21 = vld.sshfl [vmem:[#allocation1 + $0x10] sm:$0xff pattern:$0x73625140]  ;;  %v741_v22 = vld.sshfl [vmem:[#allocation1 + $0x8] sm:$0xff pattern:$0x73625140] }
  0x56   : > { %747 = vrot.lane.b32.xlu1 %v741_v22, %s1381_s25  ;;  %v739_v23 = vld.sshfl [vmem:[#allocation1] sm:$0xff pattern:$0x73625140] }
  0x57   : > { %745 = vrot.lane.b32.xlu0 %v739_v23, %s1381_s25  ;;  %791 = vst [vmem:[#allocation1] ss:$4 sm:$0xff] %v361_v0 }
  0x59   : > { %749 = vrot.lane.b32.xlu2 %v743_v21, %s1381_s25 }
  0x5e   : > { %v794_v24 = vld.sshfl [vmem:[#allocation1 + $0x8] sm:$0xff pattern:$0x73625140]  ;;  %v792_v25 = vld.sshfl [vmem:[#allocation1] sm:$0xff pattern:$0x73625140] }
  0x5f   : > { %800 = vrot.lane.b32.xlu1 %v794_v24, %s1382_s26  ;;  %798 = vrot.lane.b32.xlu0 %v792_v25, %s1382_s26  ;;  %v796_v26 = vld.sshfl [vmem:[#allocation1 + $0x10] sm:$0xff pattern:$0x73625140] }
  0x61   : > { %802 = vrot.lane.b32.xlu2 %v796_v26, %s1382_s26 }
  0x67   : > { %857 = vperm.xlu0 %1328, %v854_v61  }
  0x6f   : > { %1088 = vperm.xlu0 %1328, %v1082_v2   ;;  %v1077_v2 = vld [vmem:[%s1717_s6 + $0x10] sm:$0x1f] }
  0x70   : > { %vm1080_vm11 = vcmp.gt.f32.partialorder %v1077_v2, 0.5  ;;  %v1174_v2 = vld [vmem:[%s1716_s5] sm:$0xff] }
  0x77   : > { %1112 = vperm.xlu0 %1328, %v1103_v11  }
  0x7f   : > { %1142 = vperm.xlu0 %1328, %v1133_v19  }
  0x83   : > { %v468_v30 = vpop.permute.xlu2 %467 }
  0x87   : > { %1184 = vperm.xlu0 %1328, %v1175_v28  }
  0x8a   : > { %v375_v31 = vpop.permute.xlu0 %374  ;;  %v379_v33 = vpop.permute.xlu1 %378 }
  0x8b   : > { %v470_v32 = vpop.permute.xlu2 %469 }
  0x8c   : > { %v473_v34 = vsel %vm471_vm2, %v468_v30, %v470_v32 }
  0x8d   : > { %v481_v38 = vsel %vm387_vm0, %v473_v34, 0 }
  0x92   : > { %v377_v35 = vpop.permute.xlu0 %376 }
  0x93   : > { %v381_v36 = vsel %vm380_vm3, %v375_v31, %v377_v35  ;;  %v382_v37 = vsel %vm380_vm3, %v377_v35, %v379_v33  ;;  %v536_v45 = vpop.permute.xlu2 %535 }
  0x94   : > { %v389_v39 = vsel %vm387_vm0, %v381_v36, 0  ;;  %v392_v40 = vsel %vm387_vm0, %v382_v37, 0  ;;  %v1289_v36 = vld [vmem:[%s1712_s1 + $0x20] sm:$0xf] }
  0x95   : > { %401 = vmatpush.bf16.msra.mxu0 %v389_v39  ;;  %414 = vmatpush.bf16.msra.mxu1 %v392_v40 }
  0x98   : > { %1267 = vmatmul.msk.bf16.vlgmr.msra.gmra.mxu0 %vm383_vm1, %v1266_v41  ;;  %1268 = vmatmul.msk.bf16.vlgmr.msra.gmra.mxu1 %vm383_vm1, %v1266_v41 }
  0x99   : > { %503 = vmatpush.bf16.msrb.mxu1 %v481_v38 }
  0x9b   : > { %v466_v42 = vpop.permute.xlu1 %465  ;;  %v587_v54 = vpop.permute.xlu2 %586 }
  0x9c   : > { %v472_v43 = vsel %vm471_vm2, %v466_v42, %v468_v30 }
  0x9d   : > { %v478_v44 = vsel %vm387_vm0, %v472_v43, 0 }
  0x9e   : > { %490 = vmatpush.bf16.msrb.mxu0 %v478_v44 }
  0xa3   : > { %v640_v0 = vpop.permute.xlu2 %639 }
  0xa4   : > { %v534_v46 = vpop.permute.xlu1 %533 }
  0xa5   : > { %v532_v47 = vpop.permute.xlu0 %531  ;;  %v539_v48 = vsel %vm537_vm4, %v534_v46, %v536_v45 }
  0xa6   : > { %v538_v50 = vsel %vm537_vm4, %v532_v47, %v534_v46  ;;  %v547_v51 = vsel %vm387_vm0, %v539_v48, 0 }
  0xa7   : > { %v544_v52 = vsel %vm387_vm0, %v538_v50, 0  ;;  %569 = vmatpush.bf16.msrb.mxu3 %v547_v51 }
  0xa8   : > { %556 = vmatpush.bf16.msrb.mxu2 %v544_v52  ;;  %1272 = vmatmul.msk.bf16.vlgmr.msrb.gmra.mxu0 %vm383_vm1, %v1271_v49  ;;  %v439_v37 = vpop.f32.mrf.mxu2  ;;  %v452_v38 = vpop.f32.mrf.mxu3 }
  0xa9   : > { %1273 = vmatmul.msk.bf16.vlgmr.msrb.gmra.mxu1 %vm383_vm1, %v1271_v49 }
  0xaa   : > { %1277 = vmatmul.msk.bf16.vlgmr.msrb.gmra.mxu3 %vm383_vm1, %v1275_v53 }
  0xab   : > { %1276 = vmatmul.msk.bf16.vlgmr.msrb.gmra.mxu2 %vm383_vm1, %v1275_v53  ;;  %v699_v10 = vpop.permute.xlu2 %698 }
  0xad   : > { %v585_v55 = vpop.permute.xlu1 %584 }
  0xae   : > { %v590_v57 = vsel %vm588_vm5, %v585_v55, %v587_v54  ;;  %v583_v58 = vpop.permute.xlu0 %582 }
  0xaf   : > { %v598_v59 = vsel %vm387_vm0, %v590_v57, 0  ;;  %v589_v60 = vsel %vm588_vm5, %v583_v58, %v585_v55  ;;  %v873_v58 = vld [vmem:[%s1715_s4] sm:$0xff] }
  0xb0   : > { %v595_v63 = vsel %vm387_vm0, %v589_v60, 0  ;;  %620 = vmatpush.bf16.msra.mxu1 %v598_v59  ;;  %v441_v39 = vpop.f32.mrf.mxu2  ;;  %v454_v40 = vpop.f32.mrf.mxu3  ;;  %878 = vperm.xlu1 %1329, %v873_v58  }
  0xb1   : > { %607 = vmatpush.bf16.msra.mxu0 %v595_v63  ;;  %v875_v63 = vld [vmem:[%s1715_s4 + $0x10] sm:$0x1f]  ;;  %v1075_v40 = vld [vmem:[%s1717_s6] sm:$0xff] }
  0xb2   : > { %vm1078_vm12 = vcmp.gt.f32.partialorder %v1075_v40, 0.5 }
  0xb3   : > { %v750_v20 = vpop.permute.xlu2 %749 }
  0xb6   : > { %v638_v3 = vpop.permute.xlu1 %637 }
  0xb7   : > { %v643_v4 = vsel %vm641_vm7, %v638_v3, %v640_v0  ;;  %v636_v5 = vpop.permute.xlu0 %635 }
  0xb8   : > { %v651_v6 = vsel %vm387_vm0, %v643_v4, 0  ;;  %v642_v7 = vsel %vm641_vm7, %v636_v5, %v638_v3  ;;  %1278 = vmatmul.msk.bf16.vlgmr.msra.gmra.mxu0 %vm383_vm1, %v1274_v1  ;;  %888 = vperm.xlu1 %1329, %v875_v63   ;;  %v1549_v3 = vld [vmem:[%s1720_s9] sm:$0xff]  ;;  %v1083_v4 = vsel %vm1080_vm11, 1, %v1383_v56 }
  0xb9   : > { %v648_v8 = vsel %vm387_vm0, %v642_v7, 0  ;;  %673 = vmatpush.bf16.msra.mxu3 %v651_v6  ;;  %1279 = vmatmul.msk.bf16.vlgmr.msra.gmra.mxu1 %vm383_vm1, %v1274_v1  ;;  %v512_v6 = vperm.slane %v1549_v3, 0  ;;  %v1132_v63 = vld [vmem:[%s1719_s8] sm:$0xff] }
  0xba   : > { %660 = vmatpush.bf16.msra.mxu2 %v648_v8  ;;  %v513_v8 = vperm.slane %v1549_v3, 4 }
  0xbb   : > { %v803_v29 = vpop.permute.xlu2 %802 }
  0xbc   : > { %1282 = vmatmul.msk.bf16.vlgmr.msra.gmra.mxu3 %vm383_vm1, %v1280_v9  ;;  %v517_v19 = vperm.slane %v513_v8, 0 }
  0xbd   : > { %1281 = vmatmul.msk.bf16.vlgmr.msra.gmra.mxu2 %vm383_vm1, %v1280_v9 }
  0xbf   : > { %v697_v12 = vpop.permute.xlu1 %696 }
  0xc0   : > { %v702_v13 = vsel %vm700_vm8, %v697_v12, %v699_v10  ;;  %v695_v14 = vpop.permute.xlu0 %694  ;;  %1091 = vperm.xlu1 %1329, %v1083_v4   ;;  %v844_v10 = vperm.slane %v1549_v3, 1 }
  0xc1   : > { %v710_v15 = vsel %vm387_vm0, %v702_v13, 0  ;;  %v701_v16 = vsel %vm700_vm8, %v695_v14, %v697_v12  ;;  %v845_v13 = vperm.slane %v1549_v3, 5 }
  0xc2   : > { %v707_v17 = vsel %vm387_vm0, %v701_v16, 0  ;;  %732 = vmatpush.bf16.msrb.mxu1 %v710_v15  ;;  %v516_v15 = vperm.slane %v512_v6, 0 }
  0xc3   : > { %719 = vmatpush.bf16.msrb.mxu0 %v707_v17 }
  0xc8   : > { %v748_v21 = vpop.permute.xlu1 %747  ;;  %1285 = vmatmul.msk.bf16.vlgmr.msrb.gmra.mxu0 %vm383_vm1, %v1284_v18 }
  0xc9   : > { %v753_v22 = vsel %vm751_vm9, %v748_v21, %v750_v20  ;;  %v746_v23 = vpop.permute.xlu0 %745  ;;  %1286 = vmatmul.msk.bf16.vlgmr.msrb.gmra.mxu1 %vm383_vm1, %v1284_v18 }
  0xca   : > { %v761_v24 = vsel %vm387_vm0, %v753_v22, 0  ;;  %v752_v25 = vsel %vm751_vm9, %v746_v23, %v748_v21  ;;  %v848_v23 = vperm.slane %v844_v10, 1 }
  0xcb   : > { %v758_v26 = vsel %vm387_vm0, %v752_v25, 0  ;;  %783 = vmatpush.bf16.msrb.mxu3 %v761_v24 }
  0xcc   : > { %770 = vmatpush.bf16.msrb.mxu2 %v758_v26 }
  0xce   : > { %1288 = vmatmul.msk.bf16.vlgmr.msrb.gmra.mxu3 %vm383_vm1, %v1283_v27 }
  0xcf   : > { %1287 = vmatmul.msk.bf16.vlgmr.msrb.gmra.mxu2 %vm383_vm1, %v1283_v27  ;;  %v849_v27 = vperm.slane %v845_v13, 1 }
  0xd1   : > { %v801_v30 = vpop.permute.xlu1 %800  ;;  %v799_v31 = vpop.permute.xlu0 %798 }
  0xd2   : > { %v806_v32 = vsel %vm804_vm10, %v801_v30, %v803_v29  ;;  %v805_v33 = vsel %vm804_vm10, %v799_v31, %v801_v30  ;;  %v1104_v31 = vld [vmem:[%s1718_s7 + $0x10] sm:$0x1f] }
  0xd3   : > { %v814_v34 = vsel %vm387_vm0, %v806_v32, 0  ;;  %v811_v35 = vsel %vm387_vm0, %v805_v33, 0  ;;  %1117 = vperm.xlu1 %1329, %v1104_v31   ;;  %vm899_vm0 = vcmask 64512  }
  0xd4   : > { %823 = vmatpush.bf16.msra.mxu0 %v811_v35  ;;  %836 = vmatpush.bf16.msra.mxu1 %v814_v34 }
  0xd8   : > { %1290 = vmatmul.msk.bf16.vlgmr.msra.gmra.mxu0 %vm383_vm1, %v1289_v36 }
  0xd9   : > { %1291 = vmatmul.msk.bf16.vlgmr.msra.gmra.mxu1 %vm383_vm1, %v1289_v36  ;;  %v874_v36 = vld [vmem:[%s1715_s4 + $0x8] sm:$0xff] }
  0xda   : > { %883 = vperm.xlu2 %1330, %v874_v36  }
 0x115   : > { %v403_v41 = vpop.f32.mrf.mxu0  ;;  %v416_v42 = vpop.f32.mrf.mxu1 }
 0x116   : > { %v440_v9 = vadd.f32 %v439_v37, %v403_v41  ;;  %v453_v11 = vadd.f32 %v452_v38, %v416_v42 }
 0x11d   : > { %v405_v43 = vpop.f32.mrf.mxu0  ;;  %v418_v44 = vpop.f32.mrf.mxu1 }
 0x11e   : > { %v858_v43 = vpop.permute.xlu0 %857 }
 0x125   : > { %v492_v45 = vpop.f32.mrf.mxu0 }
 0x126   : > { %v505_v46 = vpop.f32.mrf.mxu1  ;;  %v509_v14 = vadd.f32 %v492_v45, %v440_v9  ;;  %v1587_v6 = vpop.permute.xlu0 %1088 }
 0x127   : > { %v510_v18 = vadd.f32 %v505_v46, %v453_v11  ;;  %v1134_v46 = vld [vmem:[%s1719_s8 + $0x10] sm:$0x1f]  ;;  %vm1094_vm8 = vcmp.eq.s32.totalorder %v1587_v6, 1 }
 0x128   : > { %v518_v28 = vmul.f32 %v516_v15, %v509_v14  ;;  %1147 = vperm.xlu1 %1329, %v1134_v46  }
 0x129   : > { %v519_v32 = vmul.f32 %v517_v19, %v510_v18  ;;  %v1121_v19 = vperm.slane %v1549_v3, 6 }
 0x12d   : > { %v571_v47 = vpop.f32.mrf.mxu3  ;;  %v494_v48 = vpop.f32.mrf.mxu0 }
 0x12e   : > { %v558_v49 = vpop.f32.mrf.mxu2  ;;  %v507_v50 = vpop.f32.mrf.mxu1 }
 0x12f   : > { %v1113_v14 = vpop.permute.xlu0 %1112 }
 0x134   : > { %v884_v4 = vpop.permute.xlu2 %883 }
 0x135   : > { %v573_v51 = vpop.f32.mrf.mxu3  ;;  %v609_v52 = vpop.f32.mrf.mxu0 }
 0x136   : > { %v560_v53 = vpop.f32.mrf.mxu2  ;;  %v622_v54 = vpop.f32.mrf.mxu1  ;;  %v610_v16 = vadd.f32 %v609_v52, %v558_v49  ;;  %v1081_v51 = vsel %vm1078_vm12, 1, %v1383_v56  ;;  %v1176_v56 = vld [vmem:[%s1716_s5 + $0x10] sm:$0x1f] }
 0x137   : > { %v623_v20 = vadd.f32 %v622_v54, %v571_v47  ;;  %1085 = vperm.xlu2 %1330, %v1081_v51   ;;  %1189 = vperm.xlu1 %1329, %v1176_v56  }
 0x13d   : > { %v611_v55 = vpop.f32.mrf.mxu0 }
 0x13e   : > { %v624_v57 = vpop.f32.mrf.mxu1 }
 0x13f   : > { %v675_v59 = vpop.f32.mrf.mxu3 }
 0x140   : > { %v662_v60 = vpop.f32.mrf.mxu2  ;;  %v680_v24 = vadd.f32 %v675_v59, %v623_v20  ;;  %v1308_v59 = vld [vmem:[%s1714_s3] sm:$0xff]  ;;  %v1151_v20 = vperm.slane %v1549_v3, 7 }
 0x141   : > { %v679_v21 = vadd.f32 %v662_v60, %v610_v16  ;;  %v1120_v16 = vperm.slane %v1549_v3, 2 }
 0x142   : > { %v682_v37 = vadd.f32 %v680_v24, %v519_v32  ;;  %v1599_v31 = vperm.slane %v1151_v20, 3 }
 0x143   : > { %v681_v34 = vadd.f32 %v679_v21, %v518_v28 }
 0x145   : > { %v721_v61 = vpop.f32.mrf.mxu0 }
 0x146   : > { %v734_v62 = vpop.f32.mrf.mxu1 }
 0x147   : > { %v677_v0 = vpop.f32.mrf.mxu3 }
 0x148   : > { %v664_v1 = vpop.f32.mrf.mxu2 }
 0x14d   : > { %v723_v5 = vpop.f32.mrf.mxu0 }
 0x14e   : > { %v736_v7 = vpop.f32.mrf.mxu1  ;;  %v879_v5 = vpop.permute.xlu1 %878 }
 0x151   : > { %v785_v12 = vpop.f32.mrf.mxu3 }
 0x152   : > { %v772_v17 = vpop.f32.mrf.mxu2  ;;  %v786_v25 = vadd.f32 %v785_v12, %v734_v62  ;;  %v870_v62 = vld [vmem:[%s1714_s3 + $0x8] sm:$0x7] }
 0x153   : > { %v773_v22 = vadd.f32 %v772_v17, %v721_v61  ;;  %v1102_v61 = vld [vmem:[%s1718_s7] sm:$0xff]  ;;  %v896_v0 = vunpack.c.l.b16 %v870_v62  ;;  %v1150_v17 = vperm.slane %v1549_v3, 3  ;;  %v1143_v3 = vpop.permute.xlu0 %1142 }
 0x154   : > { %1107 = vperm.xlu2 %1330, %v1102_v61  }
 0x155   : > { %v825_v26 = vpop.f32.mrf.mxu0  ;;  %v898_v1 = vpack.c.b16 %v896_v0, %v896_v0  ;;  %v1597_v28 = vperm.slane %v1150_v17, 3 }
 0x156   : > { %v842_v29 = vadd.f32 %v825_v26, %v773_v22  ;;  %v838_v30 = vpop.f32.mrf.mxu1  ;;  %v889_v8 = vpop.permute.xlu1 %888 }
 0x157   : > { %v843_v33 = vadd.f32 %v838_v30, %v786_v25  ;;  %v1125_v30 = vperm.slane %v1121_v19, 2 }
 0x158   : > { %v850_v35 = vmul.f32 %v848_v23, %v842_v29 }
 0x159   : > { %v787_v38 = vpop.f32.mrf.mxu3  ;;  %v851_v39 = vmul.f32 %v849_v27, %v843_v33  ;;  %v1124_v27 = vperm.slane %v1120_v16, 2 }
 0x15a   : > { %v774_v41 = vpop.f32.mrf.mxu2  ;;  %v852_v42 = vadd.f32 %v850_v35, %v681_v34  ;;  %v1129_v38 = vmul.f32 %v1125_v30, %v1113_v14 }
 0x15b   : > { %v853_v44 = vadd.f32 %v851_v39, %v682_v37  ;;  %v1128_v36 = vmul.f32 %v1124_v27, %v1113_v14  ;;  %v1158_v37 = vmul.f32 %v1597_v28, %v1143_v3  ;;  %v1159_v39 = vmul.f32 %v1599_v31, %v1143_v3 }
 0x15c   : > { %v860_v45 = vadd.f32 %v858_v43, %v852_v42  ;;  %1137 = vperm.xlu2 %1330, %v1132_v63  }
 0x15d   : > { %v861_v47 = vadd.f32 %v858_v43, %v853_v44  ;;  %v827_v48 = vpop.f32.mrf.mxu0  ;;  %v1615_v51 = vadd.f32 %v1158_v37, %v1128_v36 }
 0x15e   : > { %v840_v49 = vpop.f32.mrf.mxu1  ;;  %vm862_vm13 = vcmp.gt.f32.partialorder %v860_v45, 0.0  ;;  %v864_v50 = vmul.f32 0.1, %v860_v45  ;;  %v1595_v24 = vpop.permute.xlu1 %1091 }
 0x15f   : > { %vm863_vm14 = vcmp.gt.f32.partialorder %v861_v47, 0.0  ;;  %v865_v52 = vmul.f32 0.1, %v861_v47 }
 0x160   : > { %v866_v53 = vsel %vm862_vm13, %v860_v45, %v864_v50 }
 0x161   : > { %v871_v54 = vpack.c.bf16 %v866_v53, %v866_v53  ;;  %v867_v55 = vsel %vm863_vm14, %v861_v47, %v865_v52 }
 0x162   : > { %v872_v57 = vpack.c.bf16 %v867_v55, %v867_v55  ;;  %v1618_v55 = vadd.f32 %v1159_v39, %v1129_v38 }
 0x163   : > { %v908_v58 = vsel %vm906_vm15, %v871_v54, 0 }
 0x164   : > { %920 = vmatpush.bf16.msra.mxu2 %v908_v58  ;;  %v911_v60 = vsel %vm906_vm15, %v872_v57, 0  ;;  %1179 = vperm.xlu2 %1330, %v1174_v2  }
 0x165   : > { %938 = vmatpush.bf16.msra.mxu3 %v911_v60 }
 0x166   : > { %v1118_v57 = vpop.permute.xlu1 %1117 }
 0x167   : > { %1296 = vmatmul.msk.bf16.vlgmr.msra.gmra.mxu2 %vm899_vm0, %v1308_v59  ;;  %v1624_v56 = vmul.f32 %v1124_v27, %v1118_v57  ;;  %v1626_v61 = vmul.f32 %v1125_v30, %v1118_v57 }
 0x168   : > { %1298 = vmatmul.msk.bf16.vlgmr.msra.gmra.mxu3 %vm899_vm0, %v1308_v59 }
 0x177   : > { %1297 = vmatmul.msk.bf16.gmra.mxu2 %vm899_vm0, %v898_v1 }
 0x178   : > { %1299 = vmatmul.msk.bf16.gmra.mxu3 %vm899_vm0, %v898_v1  ;;  %vm1095_vm0 = vcmp.eq.s32.totalorder %v1595_v24, 1 }
 0x191   : > { %v1589_v7 = vpop.permute.xlu2 %1085 }
 0x192   : > { %vm1093_vm1 = vcmp.eq.s32.totalorder %v1589_v7, 1 }
 0x1ae   : > { %v1108_v18 = vpop.permute.xlu2 %1107 }
 0x1af   : > { %v1126_v42 = vmul.f32 %v1124_v27, %v1108_v18  ;;  %v1127_v46 = vmul.f32 %v1125_v30, %v1108_v18 }
 0x1b6   : > { %v1138_v45 = vpop.permute.xlu2 %1137 }
 0x1b7   : > { %v1156_v48 = vmul.f32 %v1597_v28, %v1138_v45  ;;  %v1157_v49 = vmul.f32 %v1599_v31, %v1138_v45 }
 0x1b9   : > { %v1162_v63 = vadd.f32 %v1156_v48, %v1126_v42  ;;  %v1630_v0 = vadd.f32 %v1157_v49, %v1127_v46 }
 0x1be   : > { %v1180_v7 = vpop.permute.xlu2 %1179 }
 0x1ea   : > { %v922_v9 = vpop.f32.mrf.mxu2 }
 0x1eb   : > { %v923_v10 = vadd.f32 %v922_v9, %v879_v5  ;;  %v940_v11 = vpop.f32.mrf.mxu3 }
 0x1ec   : > { %v941_v12 = vadd.f32 %v940_v11, %v879_v5 }
 0x1ed   : > { %v1300_v13 = vmul.f32 -1.442695, %v923_v10  ;;  %v1063_v40 = vmul.f32 1.442695, %v923_v10 }
 0x1ee   : > { %v1301_v15 = vmul.f32 -1.442695, %v941_v12  ;;  %v1065_v52 = vmul.f32 1.442695, %v941_v12 }
 0x1ef   : > { %1331 = vpow2.f32 %v1300_v13 }
 0x1f0   : > { %1333 = vpow2.f32 %v1301_v15 }
 0x1f2   : > { %v924_v21 = vpop.f32.mrf.mxu2 }
 0x1f3   : > { %v925_v22 = vadd.f32 %v924_v21, %v884_v4  ;;  %v942_v23 = vpop.f32.mrf.mxu3 }
 0x1f4   : > { %v943_v25 = vadd.f32 %v942_v23, %v884_v4 }
 0x1f5   : > { %v1332_v26 = vpop.eup %1331  ;;  %v1302_v29 = vmul.f32 -1.442695, %v925_v22  ;;  %v1067_v5 = vmul.f32 1.442695, %v925_v22 }
 0x1f6   : > { %v1601_v32 = vadd.f32 1.0, %v1332_v26  ;;  %v1334_v33 = vpop.eup %1333  ;;  %v1303_v34 = vmul.f32 -1.442695, %v943_v25  ;;  %v1069_v14 = vmul.f32 1.442695, %v943_v25 }
 0x1f7   : > { %1335 = vpow2.f32 %v1302_v29  ;;  %v1604_v35 = vadd.f32 1.0, %v1334_v33 }
 0x1f8   : > { %1337 = vrcp.f32 %v1601_v32  ;;  %v984_v9 = vand.u32 2147483648, %v1601_v32  ;;  %vm978_vm3 = vweird.f32 %v1601_v32 }
 0x1f9   : > { %1339 = vrcp.f32 %v1604_v35  ;;  %v997_v17 = vand.u32 2147483647, %v1604_v35  ;;  %v999_v18 = vand.u32 2147483648, %v1604_v35  ;;  %vm993_vm7 = vweird.f32 %v1604_v35 }
 0x1fa   : > { %v927_v41 = vpop.f32.mrf.mxu2  ;;  %1341 = vpow2.f32 %v1303_v34  ;;  %v985_v23 = vor.u32 1.1754944e-38, %v984_v9  ;;  %v1148_v9 = vpop.permute.xlu1 %1147 }
 0x1fb   : > { %v1609_v43 = vadd.f32 %v927_v41, %v889_v8  ;;  %v945_v44 = vpop.f32.mrf.mxu3  ;;  %1343 = vpow2.f32 %v1063_v40  ;;  %vm998_vm10 = vcmp.eq.f32.partialorder %v997_v17, 8.507059e+37  ;;  %v1000_v34 = vor.u32 1.1754944e-38, %v999_v18 }
 0x1fc   : > { %v1611_v47 = vadd.f32 %v945_v44, %v889_v8  ;;  %v982_v8 = vand.u32 2147483647, %v1601_v32 }
 0x1fd   : > { %v1336_v50 = vpop.eup %1335  ;;  %v1304_v53 = vmul.f32 -1.442695, %v1609_v43  ;;  %v1071_v49 = vmul.f32 1.442695, %v1609_v43 }
 0x1fe   : > { %v1338_v54 = vpop.eup %1337  ;;  %v1620_v58 = vadd.f32 1.0, %v1336_v50  ;;  %v1305_v59 = vmul.f32 -1.442695, %v1611_v47  ;;  %vm983_vm6 = vcmp.eq.f32.partialorder %v982_v8, 8.507059e+37  ;;  %v1073_v50 = vmul.f32 1.442695, %v1611_v47 }
 0x1ff   : > { %v974_v60 = vmul.f32 %v1338_v54, %v1601_v32  ;;  %1345 = vpow2.f32 %v1304_v53  ;;  %v1340_v62 = vpop.eup %1339  ;;  %vm979_vm2 = vweird.f32 %v1338_v54 }
 0x200   : > { %1347 = vrcp.f32 %v1620_v58  ;;  %v1342_v1 = vpop.eup %1341  ;;  %v989_v4 = vmul.f32 %v1340_v62, %v1604_v35  ;;  %vm994_vm4 = vweird.f32 %v1340_v62  ;;  %vm980_vm5 = vmor %vm978_vm3, %vm979_vm2  ;;  %v1012_v40 = vand.u32 2147483647, %v1620_v58 }
 0x201   : > { %1349 = vpow2.f32 %v1065_v52  ;;  %v975_v2 = vsub.f32 1.0, %v974_v60  ;;  %v1635_v10 = vadd.f32 1.0, %v1342_v1  ;;  %v1344_v16 = vpop.eup %1343  ;;  %vm995_vm9 = vmor %vm993_vm7, %vm994_vm4  ;;  %v1014_v41 = vand.u32 2147483648, %v1620_v58 }
 0x202   : > { %1351 = vpow2.f32 %v1305_v59  ;;  %v929_v11 = vpop.f32.mrf.mxu2  ;;  %v990_v13 = vsub.f32 1.0, %v989_v4  ;;  %vm1008_vm12 = vweird.f32 %v1620_v58  ;;  %vm1013_vm14 = vcmp.eq.f32.partialorder %v1012_v40, 8.507059e+37 }
 0x203   : > { %v976_v12 = vmul.f32 %v1338_v54, %v975_v2  ;;  %v947_v15 = vpop.f32.mrf.mxu3  ;;  %1353 = vrcp.f32 %v1635_v10  ;;  %v1027_v57 = vand.u32 2147483647, %v1635_v10  ;;  %v1015_v43 = vor.u32 1.1754944e-38, %v1014_v41  ;;  %v1190_v41 = vpop.permute.xlu1 %1189 }
 0x204   : > { %v991_v21 = vmul.f32 %v1340_v62, %v990_v13  ;;  %1355 = vpow2.f32 %v1067_v5  ;;  %v1029_v47 = vand.u32 2147483648, %v1635_v10 }
 0x205   : > { %v1346_v19 = vpop.eup %1345  ;;  %v977_v20 = vadd.f32 %v1338_v54, %v976_v12  ;;  %1357 = vpow2.f32 %v1069_v14  ;;  %vm1677_vm2 = vcmp.eq.f32.partialorder %v1027_v57, 8.507059e+37 }
 0x206   : > { %v1348_v22 = vpop.eup %1347  ;;  %v1643_v25 = vadd.f32 1.0, %v1346_v19  ;;  %v992_v29 = vadd.f32 %v1340_v62, %v991_v21  ;;  %v1030_v14 = vor.u32 1.1754944e-38, %v1029_v47 }
 0x207   : > { %v1350_v26 = vpop.eup %1349  ;;  %v981_v27 = vsel %vm980_vm5, %v1338_v54, %v977_v20  ;;  %v1004_v30 = vmul.f32 %v1348_v22, %v1620_v58  ;;  %vm1009_vm11 = vweird.f32 %v1348_v22 }
 0x208   : > { %v1352_v32 = vpop.eup %1351  ;;  %v986_v33 = vsel %vm983_vm6, %v985_v23, %v981_v27  ;;  %1359 = vrcp.f32 %v1643_v25  ;;  %v996_v3 = vsel %vm995_vm9, %v1340_v62, %v992_v29  ;;  %vm1010_vm13 = vmor %vm1008_vm12, %vm1009_vm11  ;;  %v1044_v15 = vand.u32 2147483648, %v1643_v25 }
 0x209   : > { %v1096_v35 = vsel %vm1093_vm1, %v1344_v16, %v986_v33  ;;  %v1005_v36 = vsub.f32 1.0, %v1004_v30  ;;  %v1651_v37 = vadd.f32 1.0, %v1352_v32  ;;  %v1354_v38 = vpop.eup %1353  ;;  %v1001_v39 = vsel %vm998_vm10, %v1000_v34, %v996_v3  ;;  %v1185_v16 = vpop.permute.xlu0 %1184 }
 0x20a   : > { %v1168_v42 = vadd.f32 %v1162_v63, %v1096_v35  ;;  %v1356_v44 = vpop.eup %1355  ;;  %v1097_v45 = vsel %vm1093_vm1, %v1350_v26, %v1001_v39  ;;  %v1019_v48 = vmul.f32 %v1354_v38, %v1635_v10  ;;  %vm1024_vm15 = vweird.f32 %v1354_v38 }
 0x20b   : > { %v1006_v46 = vmul.f32 %v1348_v22, %v1005_v36  ;;  %1361 = vrcp.f32 %v1651_v37  ;;  %v1358_v52 = vpop.eup %1357  ;;  %v1169_v59 = vadd.f32 %v1630_v0, %v1097_v45  ;;  %vm1023_vm1 = vweird.f32 %v1635_v10 }
 0x20c   : > { %v1020_v54 = vsub.f32 1.0, %v1019_v48  ;;  %v1192_v60 = vmul.f32 %v1180_v7, %v1168_v42  ;;  %1363 = vpow2.f32 %v1071_v49  ;;  %vm1025_vm3 = vmor %vm1023_vm1, %vm1024_vm15  ;;  %v1042_v10 = vand.u32 2147483647, %v1643_v25 }
 0x20d   : > { %v1007_v53 = vadd.f32 %v1348_v22, %v1006_v46  ;;  %v1193_v0 = vmul.f32 %v1180_v7, %v1169_v59  ;;  %1365 = vpow2.f32 %v1073_v50  ;;  %vm1038_vm5 = vweird.f32 %v1643_v25 }
 0x20e   : > { %v1360_v58 = vpop.eup %1359  ;;  %v1021_v63 = vmul.f32 %v1354_v38, %v1020_v54  ;;  %1198 = vst [vmem:[%s1667_s11] sm:$0xff] %v1192_v60  ;;  %vm1043_vm7 = vcmp.eq.f32.partialorder %v1042_v10, 8.507059e+37  ;;  %v1045_v30 = vor.u32 1.1754944e-38, %v1044_v15  ;;  %v1059_v32 = vand.u32 2147483648, %v1651_v37 }
 0x20f   : > { %v1011_v62 = vsel %vm1010_vm13, %v1348_v22, %v1007_v53  ;;  %v1034_v1 = vmul.f32 %v1360_v58, %v1643_v25  ;;  %1199 = vst [vmem:[%s1667_s11 + $0x8] sm:$0xff] %v1193_v0  ;;  %vm1039_vm4 = vweird.f32 %v1360_v58  ;;  %v1057_v6 = vand.u32 2147483647, %v1651_v37 }
 0x210   : > { %v1016_v2 = vsel %vm1013_vm14, %v1015_v43, %v1011_v62  ;;  %v1022_v5 = vadd.f32 %v1354_v38, %v1021_v63  ;;  %vm1040_vm6 = vmor %vm1038_vm5, %vm1039_vm4  ;;  %v1161_v3 = vmul.f32 %v1599_v31, %v1148_v9  ;;  %v1060_v39 = vor.u32 1.1754944e-38, %v1059_v32 }
 0x211   : > { %v1098_v4 = vsel %vm1094_vm8, %v1356_v44, %v1016_v2  ;;  %v1035_v11 = vsub.f32 1.0, %v1034_v1  ;;  %v1362_v12 = vpop.eup %1361  ;;  %vm1058_vm11 = vcmp.eq.f32.partialorder %v1057_v6, 8.507059e+37 }
 0x212   : > { %v1170_v13 = vadd.f32 %v1615_v51, %v1098_v4  ;;  %v1026_v17 = vsel %vm1025_vm3, %v1354_v38, %v1022_v5  ;;  %v1049_v19 = vmul.f32 %v1362_v12, %v1651_v37  ;;  %v1160_v51 = vmul.f32 %v1597_v28, %v1148_v9  ;;  %v1364_v27 = vpop.eup %1363 }
 0x213   : > { %v1036_v18 = vmul.f32 %v1360_v58, %v1035_v11  ;;  %v1031_v21 = vsel %vm1677_vm2, %v1030_v14, %v1026_v17  ;;  %vm1054_vm9 = vweird.f32 %v1362_v12  ;;  %v1366_v38 = vpop.eup %1365  ;;  %v1167_v31 = vadd.f32 %v1161_v3, %v1626_v61 }
 0x214   : > { %v1194_v20 = vmul.f32 %v1185_v16, %v1170_v13  ;;  %v1099_v22 = vsel %vm1094_vm8, %v1358_v52, %v1031_v21  ;;  %v1050_v26 = vsub.f32 1.0, %v1049_v19  ;;  %v1166_v25 = vadd.f32 %v1160_v51, %v1624_v56 }
 0x215   : > { %v1037_v23 = vadd.f32 %v1360_v58, %v1036_v18  ;;  %v1171_v29 = vadd.f32 %v1618_v55, %v1099_v22  ;;  %vm1053_vm8 = vweird.f32 %v1651_v37 }
 0x216   : > { %1200 = vst [vmem:[%s1667_s11 + $0x10] sm:$0xff] %v1194_v20  ;;  %v1051_v28 = vmul.f32 %v1362_v12, %v1050_v26  ;;  %vm1055_vm10 = vmor %vm1053_vm8, %vm1054_vm9 }
 0x217   : > { %v1041_v33 = vsel %vm1040_vm6, %v1360_v58, %v1037_v23  ;;  %v1195_v34 = vmul.f32 %v1185_v16, %v1171_v29 }
 0x218   : > { %v1046_v35 = vsel %vm1043_vm7, %v1045_v30, %v1041_v33  ;;  %v1052_v36 = vadd.f32 %v1362_v12, %v1051_v28 }
 0x219   : > { %v1100_v55 = vsel %vm1095_vm0, %v1364_v27, %v1046_v35  ;;  %1201 = vst [vmem:[%s1667_s11 + $0x18] sm:$0xff] %v1195_v34 }
 0x21a   : > { %v1172_v40 = vadd.f32 %v1166_v25, %v1100_v55  ;;  %v1056_v42 = vsel %vm1055_vm10, %v1362_v12, %v1052_v36 }
 0x21b   : > { %v1061_v56 = vsel %vm1058_vm11, %v1060_v39, %v1056_v42 }
 0x21c   : > { %v1196_v44 = vmul.f32 %v1190_v41, %v1172_v40  ;;  %v1101_v45 = vsel %vm1095_vm0, %v1366_v38, %v1061_v56 }
 0x21d   : > { %v1173_v37 = vadd.f32 %v1167_v31, %v1101_v45 }
 0x21e   : > { %1202 = vst [vmem:[%s1667_s11 + $0x20] sm:$0x1f] %v1196_v44 }
 0x21f   : > { %v1197_v46 = vmul.f32 %v1190_v41, %v1173_v37 }
 0x221   : > { %1203 = vst [vmem:[%s1667_s11 + $0x28] sm:$0x1f] %v1197_v46 }
 0x222 PF: > { %s20_s13 = sadd.s32 1, %s1373_s13  }
 0x223   : > { %p17_p4 = scmp.ge.s32.totalorder %s20_s13, 4  }
 0x225   :  { %19 = sbr.rel (!%p17_p4) target bundleno = 1 (0x1), region = 98 }

</bundles_post_ra>
